<compile_context>
chip_gen: v6e
topology: v6e:2x2x1
jax: 0.10.0
libtpu: 0.0.40
codegen_flags: <defaults>
</compile_context>

<pallas_src>
import functools

import jax
import jax.numpy as jnp
from jax.experimental import pallas as pl
from jax.experimental.pallas import tpu as pltpu


def _round_up(x, m):
    return ((x + m - 1) // m) * m


# ----------------------------------------------------------------------------
# Pallas kernel: fused GCNConv + residual + node-sum + MLP head, TB graphs/step
# ----------------------------------------------------------------------------
def gnn_critic_kernel(x_ref, m_ref, w_ref, b_ref, o_ref, *, nf, hid):
    # x_ref: [TB, NF]   bf16  node features, (node, feature) flattened onto lanes
    # m_ref: [NF, NF]   bf16  kron(A_hat^T, Wg): fused GCN aggregate + transform
    # w_ref: [R, hid]   bf16  rows 0:NF  = tile(W1, (N,1))  (node-sum folded in)
    #                         rows NF:NF+hid = W2 ; row NF+hid = W3^T
    # b_ref: [8, >=NF]  f32   rows: bg tiled per node, b1, b2, b3 (col 0)
    # o_ref: [1, TB]    f32   per-graph value V(s), lane-dense
    x = x_ref[...]                                               # [TB, NF] bf16

    w1t = w_ref[0:nf, 0:hid]                                     # [NF, hid]
    w2 = w_ref[nf:nf + hid, 0:hid]                               # [hid, hid]
    w3 = w_ref[nf + hid:nf + hid + 1, 0:hid]                     # [1, hid]

    bg = b_ref[0:1, 0:nf]                                        # [1, NF]
    b1 = b_ref[1:2, 0:hid]                                       # [1, hid]
    b2 = b_ref[2:3, 0:hid]                                       # [1, hid]
    b3 = b_ref[3:4, 0:1]                                         # [1, 1]

    # --- GCNConv: relu(A_hat @ (X Wg) + bg) for all graphs as ONE fat matmul
    # against the stationary Kronecker operator (bf16 in, f32 accumulation). ---
    h = jnp.dot(x, m_ref[...], preferred_element_type=jnp.float32)    # [TB, NF]
    h = jnp.maximum(h + bg, 0.0)

    # --- residual; node-sum is folded into lin1 (W1 tiled over nodes), so the
    # next matmul pools over nodes and projects to hidden in one shot (VPU adds
    # + one MXU matmul; no ones-row M=1 matmuls, no cross-lane reductions). ---
    xr = (h + x.astype(jnp.float32)).astype(jnp.bfloat16)             # [TB, NF]

    z = jnp.dot(xr, w1t, preferred_element_type=jnp.float32) + b1     # [TB, hid]
    z = jnp.maximum(z, 0.0).astype(jnp.bfloat16)
    z = jnp.dot(z, w2, preferred_element_type=jnp.float32) + b2       # [TB, hid]
    z = jnp.maximum(z, 0.0).astype(jnp.bfloat16)

    # --- lin3 emitted lane-dense: [1, hid] contracted with [TB, hid] -> [1, TB]
    v = jax.lax.dot_general(w3, z, (((1,), (1,)), ((), ())),
                            preferred_element_type=jnp.float32)
    o_ref[...] = v + b3                                               # scalar broadcast (no lane slice)


# ----------------------------------------------------------------------------
# Parameter fusion/packing: 3 small constant-index operands
# ----------------------------------------------------------------------------
def pack_params(a_hat, params, num_nodes):
    """Returns (m_op, w_slab, b_slab).  Tiny XLA work; in training it lives under
    the same jit as the pallas_call (params change each step, A_hat never does)."""
    wg, bg, w1, b1, w2, b2, w3, b3 = params
    fin = wg.shape[0]
    hid = w1.shape[1]
    nf = num_nodes * fin

    # Fused GCN operator:  (A_hat @ (X Wg))[b, i*fin+o] == (Xflat @ kron(A_hat^T, Wg))[b, i*fin+o]
    m_op = jnp.kron(a_hat.T.astype(jnp.float32), wg.astype(jnp.float32)).astype(jnp.bfloat16)

    rows = _round_up(nf + hid + 1, 16)                 # bf16 sublane tile = 16
    w_slab = jnp.zeros((rows, hid), jnp.float32)
    w_slab = w_slab.at[0:nf, :].set(jnp.tile(w1, (num_nodes, 1)))   # node-sum folded into lin1
    w_slab = w_slab.at[nf:nf + hid, :].set(w2)
    w_slab = w_slab.at[nf + hid, :].set(w3[:, 0])
    w_slab = w_slab.astype(jnp.bfloat16)

    b_slab = jnp.zeros((8, max(nf, hid)), jnp.float32)              # biases stay f32
    b_slab = b_slab.at[0, 0:nf].set(jnp.tile(bg[0], num_nodes))     # GCN bias, tiled per node
    b_slab = b_slab.at[1, 0:hid].set(b1[0])
    b_slab = b_slab.at[2, 0:hid].set(b2[0])
    b_slab = b_slab.at[3, 0].set(b3[0, 0])
    return m_op, w_slab, b_slab


# ----------------------------------------------------------------------------
# Grid-step sizing
# ----------------------------------------------------------------------------
def _choose_tb(batch):
    """Graphs per grid step.

    Multi-step grids need tb % 128 == 0 (lane-dense [1, tb] output blocks).
    v7x has 2 TensorCores -> prefer an even number of 'parallel' steps when the
    batch allows; otherwise one full-extent step (v6e sweet spot, legal for any
    B).  The cap keeps per-step VMEM well under the v5e 16 MiB scoped default.
    """
    cap = 2048
    if batch <= cap:
        if batch % 256 == 0:
            return batch // 2          # 2 even parallel steps (v7x), tb % 128 == 0
        return batch                   # single full-extent step
    for tb in range(cap, 127, -128):   # large batch: even 128-multiple tiles
        if batch % tb == 0:
            return tb
    return batch                       # TODO(synk): pad huge odd batches to a 128-multiple


# ----------------------------------------------------------------------------
# Wrapper
# ----------------------------------------------------------------------------
def gnn_critic_forward(a_hat, x, params):
    """a_hat: [N, N] shared normalized adjacency (static topology, built once).
    x: [B, N, Fin] (or [N, Fin] for a single graph).  Returns V(s): [B] (or [1])."""
    single = (x.ndim == 2)
    if single:
        x = x[None]
    batch, num_nodes, fin = x.shape
    hid = params[2].shape[1]
    nf = num_nodes * fin

    m_op, w_slab, b_slab = pack_params(a_hat, params, num_nodes)
    x_flat = x.reshape(batch, nf).astype(jnp.bfloat16)   # free reshape; bf16 halves HBM bytes

    tb = _choose_tb(batch)
    grid = (batch // tb,)

    out = pl.pallas_call(
        functools.partial(gnn_critic_kernel, nf=nf, hid=hid),
        out_shape=jax.ShapeDtypeStruct((1, batch), jnp.float32),
        grid=grid,
        in_specs=[
            pl.BlockSpec((tb, nf), lambda i: (i, 0)),         # X: the only per-step stream
            pl.BlockSpec(m_op.shape, lambda i: (0, 0)),       # fused GCN operator: fetched once
            pl.BlockSpec(w_slab.shape, lambda i: (0, 0)),     # MLP weights: fetched once
            pl.BlockSpec(b_slab.shape, lambda i: (0, 0)),     # biases: fetched once
        ],
        out_specs=pl.BlockSpec((1, tb), lambda i: (0, i)),    # lane-dense value row
        compiler_params=pltpu.CompilerParams(
            dimension_semantics=("parallel",)),               # batch steps -> both v7x cores
    )(x_flat, m_op, w_slab, b_slab)

    vals = out[0]
    return vals[0:1] if single else vals


# ----------------------------------------------------------------------------
# Glue: dense symmetric-normalized adjacency (torch_geometric gcn_norm semantics)
# Static topology -> build ONCE and reuse (hoisted out of the per-step path).
# ----------------------------------------------------------------------------
def gcn_norm_dense(edge_index, num_nodes):
    """A_hat[target, source] = d[t]^-1/2 * d[s]^-1/2, with self-loops added."""
    row, col = edge_index  # source, target
    loop = jnp.arange(num_nodes, dtype=row.dtype)
    row = jnp.concatenate([row, loop])
    col = jnp.concatenate([col, loop])
    adj = jnp.zeros((num_nodes, num_nodes), jnp.float32).at[col, row].add(1.0)
    deg = adj.sum(axis=1)
    d_inv_sqrt = jnp.where(deg > 0, 1.0 / jnp.sqrt(deg), 0.0)
    return d_inv_sqrt[:, None] * adj * d_inv_sqrt[None, :]


# ----------------------------------------------------------------------------
# Deterministic parameter init (shapes from GNNCritic.__init__)
# ----------------------------------------------------------------------------
def init_params(key, in_channels, hidden=32):
    ks = jax.random.split(key, 8)
    scale = 0.1
    wg = scale * jax.random.normal(ks[0], (in_channels, in_channels), jnp.float32)
    bg = scale * jax.random.normal(ks[1], (1, in_channels), jnp.float32)
    w1 = scale * jax.random.normal(ks[2], (in_channels, hidden), jnp.float32)
    b1 = scale * jax.random.normal(ks[3], (1, hidden), jnp.float32)
    w2 = scale * jax.random.normal(ks[4], (hidden, hidden), jnp.float32)
    b2 = scale * jax.random.normal(ks[5], (1, hidden), jnp.float32)
    w3 = scale * jax.random.normal(ks[6], (hidden, 1), jnp.float32)
    b3 = scale * jax.random.normal(ks[7], (1, 1), jnp.float32)
    return (wg, bg, w1, b1, w2, b2, w3, b3)


# ----------------------------------------------------------------------------
# Pure-JAX reference (f32, unfused) for verification
# ----------------------------------------------------------------------------
def reference_forward(a_hat, x_b, params):
    wg, bg, w1, b1, w2, b2, w3, b3 = params
    h = jnp.maximum(jnp.einsum('ij,bjf->bif', a_hat, x_b @ wg) + bg, 0.0)
    xr = h + x_b
    s = jnp.sum(xr, axis=1)
    z = jnp.maximum(s @ w1 + b1, 0.0)
    z = jnp.maximum(z @ w2 + b2, 0.0)
    return (z @ w3 + b3)[:, 0]


if __name__ == "__main__":
    key = jax.random.PRNGKey(0)
    N = 16            # graph nodes (regions)
    IN_CHANNELS = 16  # node feature dim
    HIDDEN = 32
    B = 64            # graphs per pallas_call

    k_x, k_p = jax.random.split(key)
    x = jax.random.normal(k_x, (B, N, IN_CHANNELS), jnp.float32)
    # Round inputs/weights to bf16-representable values so the kernel's bf16 feed
    # is exact and the comparison isolates true kernel error.
    x = x.astype(jnp.bfloat16).astype(jnp.float32)

    # Fixed ring topology (region graph is static): A_hat built ONCE and reused.
    src = jnp.arange(N, dtype=jnp.int32)
    dst = (src + 1) % N
    edge_index = jnp.stack([jnp.concatenate([src, dst]),
                            jnp.concatenate([dst, src])], axis=0)
    a_hat = gcn_norm_dense(edge_index, N)                 # [N, N], shared by all graphs

    params = init_params(k_p, IN_CHANNELS, HIDDEN)
    params = jax.tree_util.tree_map(
        lambda p: p.astype(jnp.bfloat16).astype(jnp.float32), params)

    fwd = jax.jit(gnn_critic_forward)                     # param packing fused under one jit
    values = fwd(a_hat, x, params)                        # [B]
    jax.block_until_ready(values)
    assert values.shape == (B,)

    ref = reference_forward(a_hat, x, params)
    err = float(jnp.max(jnp.abs(values - ref)))
    assert jnp.allclose(values, ref, atol=5e-2, rtol=5e-2), f"max abs err {err}"

    print("KERNEL_OK")
</pallas_src>

<mosaic_0001>
module attributes {stable_mosaic.version = 11 : i64} {
  func.func @gnn_critic_kernel(%arg0: i32, %arg1: memref<64x256xbf16, #tpu.memory_space<vmem>>, %arg2: memref<256x256xbf16, #tpu.memory_space<vmem>>, %arg3: memref<304x32xbf16, #tpu.memory_space<vmem>>, %arg4: memref<8x256xf32, #tpu.memory_space<vmem>>, %arg5: memref<1x64xf32, #tpu.memory_space<vmem>>) attributes {dimension_semantics = [#tpu.dimension_semantics<parallel>], iteration_bounds = array<i64: 1>, scalar_prefetch = 0 : i64, scratch_operands = 0 : i64, tpu.core_type = #tpu.core_type<tc>, window_params = [{transform_indices = @transform_0, window_bounds = array<i64: 64, 256>}, {pipeline_mode = #tpu.pipeline_mode<synchronous>, transform_indices = @transform_1, window_bounds = array<i64: 256, 256>}, {pipeline_mode = #tpu.pipeline_mode<synchronous>, transform_indices = @transform_2, window_bounds = array<i64: 304, 32>}, {pipeline_mode = #tpu.pipeline_mode<synchronous>, transform_indices = @transform_3, window_bounds = array<i64: 8, 256>}, {transform_indices = @transform_4, window_bounds = array<i64: 1, 64>}]} {
    %c0 = arith.constant 0 : index
    %c0_0 = arith.constant 0 : index
    %0 = vector.load %arg1[%c0, %c0_0] : memref<64x256xbf16, #tpu.memory_space<vmem>>, vector<64x256xbf16>
    %c0_1 = arith.constant 0 : index
    %c0_2 = arith.constant 0 : index
    %1 = vector.load %arg3[%c0_1, %c0_2] : memref<304x32xbf16, #tpu.memory_space<vmem>>, vector<256x32xbf16>
    %c256 = arith.constant 256 : index
    %c0_3 = arith.constant 0 : index
    %2 = vector.load %arg3[%c256, %c0_3] : memref<304x32xbf16, #tpu.memory_space<vmem>>, vector<32x32xbf16>
    %c288 = arith.constant 288 : index
    %c0_4 = arith.constant 0 : index
    %3 = vector.load %arg3[%c288, %c0_4] : memref<304x32xbf16, #tpu.memory_space<vmem>>, vector<1x32xbf16>
    %c0_5 = arith.constant 0 : index
    %c0_6 = arith.constant 0 : index
    %4 = vector.load %arg4[%c0_5, %c0_6] : memref<8x256xf32, #tpu.memory_space<vmem>>, vector<1x256xf32>
    %c1 = arith.constant 1 : index
    %c0_7 = arith.constant 0 : index
    %5 = vector.load %arg4[%c1, %c0_7] : memref<8x256xf32, #tpu.memory_space<vmem>>, vector<1x32xf32>
    %c2 = arith.constant 2 : index
    %c0_8 = arith.constant 0 : index
    %6 = vector.load %arg4[%c2, %c0_8] : memref<8x256xf32, #tpu.memory_space<vmem>>, vector<1x32xf32>
    %c3 = arith.constant 3 : index
    %c0_9 = arith.constant 0 : index
    %7 = vector.load %arg4[%c3, %c0_9] : memref<8x256xf32, #tpu.memory_space<vmem>>, vector<1x1xf32>
    %c0_10 = arith.constant 0 : index
    %c0_11 = arith.constant 0 : index
    %8 = vector.load %arg2[%c0_10, %c0_11] : memref<256x256xbf16, #tpu.memory_space<vmem>>, vector<256x256xbf16>
    %cst = arith.constant dense<0.000000e+00> : vector<64x256xf32>
    %9 = tpu.matmul %0, %8, %cst {dimension_numbers = #tpu.dot_dimension_numbers<[1], [0], [0], [1], [0, 0, 1, 1], [], []>} : vector<64x256xbf16>, vector<256x256xbf16>, vector<64x256xf32> -> vector<64x256xf32>
    %10 = vector.broadcast %4 : vector<1x256xf32> to vector<64x256xf32>
    %11 = arith.addf %9, %10 : vector<64x256xf32>
    %cst_12 = arith.constant 0.000000e+00 : f32
    %12 = vector.broadcast %cst_12 : f32 to vector<64x256xf32>
    %13 = arith.maximumf %11, %12 : vector<64x256xf32>
    %14 = arith.extf %0 : vector<64x256xbf16> to vector<64x256xf32>
    %15 = arith.addf %13, %14 : vector<64x256xf32>
    %16 = arith.truncf %15 : vector<64x256xf32> to vector<64x256xbf16>
    %cst_13 = arith.constant dense<0.000000e+00> : vector<64x32xf32>
    %17 = tpu.matmul %16, %1, %cst_13 {dimension_numbers = #tpu.dot_dimension_numbers<[1], [0], [0], [1], [0, 0, 1, 1], [], []>} : vector<64x256xbf16>, vector<256x32xbf16>, vector<64x32xf32> -> vector<64x32xf32>
    %18 = vector.broadcast %5 : vector<1x32xf32> to vector<64x32xf32>
    %19 = arith.addf %17, %18 : vector<64x32xf32>
    %cst_14 = arith.constant 0.000000e+00 : f32
    %20 = vector.broadcast %cst_14 : f32 to vector<64x32xf32>
    %21 = arith.maximumf %19, %20 : vector<64x32xf32>
    %22 = arith.truncf %21 : vector<64x32xf32> to vector<64x32xbf16>
    %cst_15 = arith.constant dense<0.000000e+00> : vector<64x32xf32>
    %23 = tpu.matmul %22, %2, %cst_15 {dimension_numbers = #tpu.dot_dimension_numbers<[1], [0], [0], [1], [0, 0, 1, 1], [], []>} : vector<64x32xbf16>, vector<32x32xbf16>, vector<64x32xf32> -> vector<64x32xf32>
    %24 = vector.broadcast %6 : vector<1x32xf32> to vector<64x32xf32>
    %25 = arith.addf %23, %24 : vector<64x32xf32>
    %cst_16 = arith.constant 0.000000e+00 : f32
    %26 = vector.broadcast %cst_16 : f32 to vector<64x32xf32>
    %27 = arith.maximumf %25, %26 : vector<64x32xf32>
    %28 = arith.truncf %27 : vector<64x32xf32> to vector<64x32xbf16>
    %cst_17 = arith.constant dense<0.000000e+00> : vector<1x64xf32>
    %29 = tpu.matmul %3, %28, %cst_17 {dimension_numbers = #tpu.dot_dimension_numbers<[1], [1], [0], [0], [0, 0, 1, 0], [], []>} : vector<1x32xbf16>, vector<64x32xbf16>, vector<1x64xf32> -> vector<1x64xf32>
    %30 = vector.broadcast %7 : vector<1x1xf32> to vector<1x64xf32>
    %31 = arith.addf %29, %30 : vector<1x64xf32>
    %c0_18 = arith.constant 0 : index
    %c0_19 = arith.constant 0 : index
    %32 = vector.load %arg5[%c0_18, %c0_19] : memref<1x64xf32, #tpu.memory_space<vmem>>, vector<1x64xf32>
    tpu.vector_store %arg5[%c0_18, %c0_19], %31 {strides = array<i32>} : memref<1x64xf32, #tpu.memory_space<vmem>>, vector<1x64xf32>,
    return
  }
  func.func @transform_0(%arg0: i32) -> (i32, i32) {
    %c0_i32 = arith.constant 0 : i32
    %c0_i32_0 = arith.constant 0 : i32
    return %arg0, %c0_i32 : i32, i32
  }
  func.func @transform_1(%arg0: i32) -> (i32, i32) {
    %c0_i32 = arith.constant 0 : i32
    %c0_i32_0 = arith.constant 0 : i32
    %c0_i32_1 = arith.constant 0 : i32
    return %c0_i32, %c0_i32_0 : i32, i32
  }
  func.func @transform_2(%arg0: i32) -> (i32, i32) {
    %c0_i32 = arith.constant 0 : i32
    %c0_i32_0 = arith.constant 0 : i32
    %c0_i32_1 = arith.constant 0 : i32
    return %c0_i32, %c0_i32_0 : i32, i32
  }
  func.func @transform_3(%arg0: i32) -> (i32, i32) {
    %c0_i32 = arith.constant 0 : i32
    %c0_i32_0 = arith.constant 0 : i32
    %c0_i32_1 = arith.constant 0 : i32
    return %c0_i32, %c0_i32_0 : i32, i32
  }
  func.func @transform_4(%arg0: i32) -> (i32, i32) {
    %c0_i32 = arith.constant 0 : i32
    %c0_i32_0 = arith.constant 0 : i32
    return %c0_i32, %arg0 : i32, i32
  }
}

</mosaic_0001>

<bundles_post_ra>
// kernel: tile.16
= control target key start
LH: loop header
LB: loop body
LE: loop exit
PB: predicated region body
PF: predicated region fallthrough
CT: control target
= control target key end

     0   :  { %s28_s0 = inlined_call_operand.vmem [shape: f32[16], index: 0, kind: input, shape index: {}]   ;;  %s29_s1 = inlined_call_operand.vmem [shape: f32[16,16], index: 1, kind: output, shape index: {}]  }
   0x1   :  { %v4_v0 = vld [vmem:[%s28_s0] ss:$0 sm:$0xff] }
   0x2   :  { %5 = vst [vmem:[%s29_s1] sm:$0xff] %v4_v0  ;;  %8 = vst [vmem:[%s29_s1 + $0x8] sm:$0xff] %v4_v0 }

// kernel: gnn_critic_forward.1
= control target key start
LH: loop header
LB: loop body
LE: loop exit
PB: predicated region body
PF: predicated region fallthrough
CT: control target
= control target key end

     0   :  { %s1328_s0 = inlined_call_operand.vmem [shape: bf16[64,256], index: 0, kind: input, shape index: {}]   ;;  %s1329_s1 = inlined_call_operand.vmem [shape: bf16[256,256], index: 1, kind: input, shape index: {}]   ;;  %s1330_s2 = inlined_call_operand.vmem [shape: bf16[304,32], index: 2, kind: input, shape index: {}]   ;;  %s1331_s3 = inlined_call_operand.vmem [shape: f32[8,256], index: 3, kind: input, shape index: {}]   ;;  %s1332_s4 = inlined_call_operand.hbm [shape: f32[1,64], index: 4, kind: output, shape index: {}]  }
   0x1   :  { %v934_v0 = vld [vmem:[%s1329_s1 + $0x74] ss:$8 sps:$4 sm:$0xff]   ;;  %v936_v1 = vld [vmem:[%s1329_s1 + $0x70] ss:$8 sps:$4 sm:$0xff]   ;;  %v937_v2 = vld [vmem:[%s1329_s1 + $0x64] ss:$8 sps:$4 sm:$0xff]  }
   0x2   :  { %311 = vmatprep.subr.bf16.mxu0 %v934_v0  ;;  %v939_v3 = vld [vmem:[%s1329_s1 + $0x60] ss:$8 sps:$4 sm:$0xff]   ;;  %v940_v4 = vld [vmem:[%s1329_s1 + $0x54] ss:$8 sps:$4 sm:$0xff]   ;;  %v942_v5 = vld [vmem:[%s1329_s1 + $0x50] ss:$8 sps:$4 sm:$0xff]  }
   0x3   :  { %312 = vmatpush1.bf16.msra.mxu0 %v936_v1  ;;  %v943_v6 = vld [vmem:[%s1329_s1 + $0x44] ss:$8 sps:$4 sm:$0xff]   ;;  %v945_v7 = vld [vmem:[%s1329_s1 + $0x40] ss:$8 sps:$4 sm:$0xff]   ;;  %v946_v8 = vld [vmem:[%s1329_s1 + $0x34] ss:$8 sps:$4 sm:$0xff]  }
   0x4   :  { %313 = vmatprep.subr.bf16.mxu0 %v937_v2  ;;  %v948_v9 = vld [vmem:[%s1329_s1 + $0x30] ss:$8 sps:$4 sm:$0xff]   ;;  %v949_v10 = vld [vmem:[%s1329_s1 + $0x24] ss:$8 sps:$4 sm:$0xff]   ;;  %v951_v11 = vld [vmem:[%s1329_s1 + $0x20] ss:$8 sps:$4 sm:$0xff]  }
   0x5   :  { %v952_v12 = vld [vmem:[%s1329_s1 + $0x14] ss:$8 sps:$4 sm:$0xff]   ;;  %v1101_v13 = vld [vmem:[%s1328_s0] sm:$0xff]  ;;  %v1106_v14 = vld [vmem:[%s1328_s0 + $0x8] sm:$0xff] }
   0x6   :  { %v792_v15 = vcombine.high %v1101_v13, %v1106_v14  ;;  %v954_v16 = vld [vmem:[%s1329_s1 + $0x10] ss:$8 sps:$4 sm:$0xff]   ;;  %v955_v17 = vld [vmem:[%s1329_s1 + $0x4] ss:$8 sps:$4 sm:$0xff]   ;;  %v957_v19 = vld [vmem:[%s1329_s1] ss:$8 sps:$4 sm:$0xff]  }
   0x7   :  { %314 = vmatpush1.bf16.msra.mxu0 %v939_v3  ;;  %v990_v18 = vld [vmem:[%s1330_s2 + $0x78] sm:$0xff]   ;;  %v992_v22 = vld [vmem:[%s1330_s2 + $0x70] sm:$0xff]   ;;  %v994_v24 = vld [vmem:[%s1330_s2 + $0x68] sm:$0xff]  }
   0x8   :  { %315 = vmatprep.subr.bf16.mxu0 %v940_v4  ;;  %343 = vmatprep.mubr.bf16.mxu0 %v792_v15  ;;  %v991_v20 = vld [vmem:[%s1330_s2 + $0x38] sm:$0xff]   ;;  %v993_v23 = vld [vmem:[%s1330_s2 + $0x30] sm:$0xff]   ;;  %v995_v26 = vld [vmem:[%s1330_s2 + $0x28] sm:$0xff]  }
   0x9   :  { %v958_v21 = vld [vmem:[%s1329_s1 + $0xf4] ss:$8 sps:$4 sm:$0xff]   ;;  %854 = vmatprep.subr.bf16.mxu1 %v990_v18  ;;  %v960_v25 = vld [vmem:[%s1329_s1 + $0xf0] ss:$8 sps:$4 sm:$0xff]   ;;  %v961_v27 = vld [vmem:[%s1329_s1 + $0xe4] ss:$8 sps:$4 sm:$0xff]  }
   0xa   :  { %855 = vmatpush3.bf16.msra.mxu1 %v991_v20  ;;  %v996_v28 = vld [vmem:[%s1330_s2 + $0x60] sm:$0xff]   ;;  %v964_v31 = vld [vmem:[%s1329_s1 + $0xd4] ss:$8 sps:$4 sm:$0xff]   ;;  %v966_v32 = vld [vmem:[%s1329_s1 + $0xd0] ss:$8 sps:$4 sm:$0xff]  }
   0xb   :  { %316 = vmatpush1.bf16.msra.mxu0 %v942_v5  ;;  %856 = vmatprep.subr.bf16.mxu1 %v992_v22  ;;  %v963_v29 = vld [vmem:[%s1329_s1 + $0xe0] ss:$8 sps:$4 sm:$0xff]  }
   0xc   :  { %317 = vmatprep.subr.bf16.mxu0 %v943_v6  ;;  %v997_v30 = vld [vmem:[%s1330_s2 + $0x20] sm:$0xff]  }
   0xe   :  { %857 = vmatpush3.bf16.msra.mxu1 %v993_v23 }
   0xf   :  { %318 = vmatpush1.bf16.msra.mxu0 %v945_v7  ;;  %858 = vmatprep.subr.bf16.mxu1 %v994_v24 }
  0x10   :  { %319 = vmatprep.subr.bf16.mxu0 %v946_v8 }
  0x12   :  { %859 = vmatpush3.bf16.msra.mxu1 %v995_v26 }
  0x13   :  { %320 = vmatpush1.bf16.msra.mxu0 %v948_v9  ;;  %860 = vmatprep.subr.bf16.mxu1 %v996_v28 }
  0x14   :  { %321 = vmatprep.subr.bf16.mxu0 %v949_v10 }
  0x16   :  { %861 = vmatpush3.bf16.msra.mxu1 %v997_v30 }
  0x17   :  { %322 = vmatpush1.bf16.msra.mxu0 %v951_v11 }
  0x18   :  { %323 = vmatprep.subr.bf16.mxu0 %v952_v12 }
  0x1b   :  { %324 = vmatpush1.bf16.msra.mxu0 %v954_v16 }
  0x1c   :  { %325 = vmatprep.subr.bf16.mxu0 %v955_v17 }
  0x1f   :  { %326 = vmatpush1.bf16.msra.mxu0 %v957_v19 }
  0x20   :  { %327 = vmatprep.subr.bf16.mxu0 %v958_v21 }
  0x23   :  { %328 = vmatpush2.bf16.msra.mxu0 %v960_v25 }
  0x24   :  { %329 = vmatprep.subr.bf16.mxu0 %v961_v27 }
  0x27   :  { %330 = vmatpush2.bf16.msra.mxu0 %v963_v29 }
  0x28   :  { %9 = vsyncpa [#allocation3], 0  ;;  %331 = vmatprep.subr.bf16.mxu0 %v964_v31  ;;  %v967_v33 = vld [vmem:[%s1329_s1 + $0xc4] ss:$8 sps:$4 sm:$0xff]   ;;  %v969_v34 = vld [vmem:[%s1329_s1 + $0xc0] ss:$8 sps:$4 sm:$0xff]   ;;  %v791_v45 = vcombine.low %v1101_v13, %v1106_v14  ;;  %v101_v1 = vlaneseq  ;;  %v402_v16 = vunpack.c.l.bf16 %v1106_v14  ;;  %v401_v18 = vunpack.c.h.bf16 %v1101_v13 }
  0x29   :  { %v970_v35 = vld [vmem:[%s1329_s1 + $0xb4] ss:$8 sps:$4 sm:$0xff]   ;;  %v972_v36 = vld [vmem:[%s1329_s1 + $0xb0] ss:$8 sps:$4 sm:$0xff]   ;;  %v973_v37 = vld [vmem:[%s1329_s1 + $0xa4] ss:$8 sps:$4 sm:$0xff]   ;;  %v403_v22 = vunpack.c.h.bf16 %v1106_v14  ;;  %v400_v24 = vunpack.c.l.bf16 %v1101_v13 }
  0x2a   :  { %v975_v38 = vld [vmem:[%s1329_s1 + $0xa0] ss:$8 sps:$4 sm:$0xff]   ;;  %v976_v39 = vld [vmem:[%s1329_s1 + $0x94] ss:$8 sps:$4 sm:$0xff]   ;;  %v978_v40 = vld [vmem:[%s1329_s1 + $0x90] ss:$8 sps:$4 sm:$0xff]  }
  0x2b   :  { %332 = vmatpush2.bf16.msra.mxu0 %v966_v32  ;;  %v979_v41 = vld [vmem:[%s1329_s1 + $0x84] ss:$8 sps:$4 sm:$0xff]   ;;  %v981_v42 = vld [vmem:[%s1329_s1 + $0x80] ss:$8 sps:$4 sm:$0xff]   ;;  %v1194_v43 = vld [vmem:[%s1328_s0 + $0x10] sm:$0xff]  ;;  %v102_v2 = vshrl.u32 %v101_v1, 7 }
  0x2c   :  { %333 = vmatprep.subr.bf16.mxu0 %v967_v33  ;;  %v1199_v44 = vld [vmem:[%s1328_s0 + $0x18] sm:$0xff]  ;;  %v1208_v47 = vld [vmem:[%s1328_s0 + $0x20] sm:$0xff]  ;;  %v1213_v48 = vld [vmem:[%s1328_s0 + $0x28] sm:$0xff]  ;;  %v405_v14 = vunpack.c.h.bf16 %v1194_v43  ;;  %vm625_vm0 = vcmask 261120   ;;  %vm1031_vm1 = vmmov 0   ;;  %s1033_s7 = smov [#allocation2]  }
  0x2d   :  { %v794_v46 = vcombine.high %v1194_v43, %v1199_v44  ;;  %v793_v49 = vcombine.low %v1194_v43, %v1199_v44  ;;  %v796_v50 = vcombine.high %v1208_v47, %v1213_v48  ;;  %v1222_v51 = vld [vmem:[%s1328_s0 + $0x30] sm:$0xff]  ;;  %v1227_v52 = vld [vmem:[%s1328_s0 + $0x38] sm:$0xff]  ;;  %v795_v53 = vcombine.low %v1208_v47, %v1213_v48  ;;  %v1002_v60 = vld [vmem:[%s1330_s2 + $0x48] sm:$0xff]   ;;  %s783_s8 = sshll.u32 %s1033_s7, 4  ;;  %s784_s8 = int_to_ptr.vmem [resolvable:$true] %s783_s8 }
  0x2e   :  { %v798_v54 = vcombine.high %v1222_v51, %v1227_v52  ;;  %v797_v55 = vcombine.low %v1222_v51, %v1227_v52  ;;  %v998_v56 = vld [vmem:[%s1330_s2 + $0x58] sm:$0xff]   ;;  %v1000_v58 = vld [vmem:[%s1330_s2 + $0x50] sm:$0xff]   ;;  %v1003_v61 = vld [vmem:[%s1330_s2 + $0x8] sm:$0xff]   ;;  %v107_v3 = vsub.s32 1, %v102_v2  ;;  %v103_v4 = vsub.s32 0, %v102_v2  ;;  %s1008_s9 = scalar_lea.vmem %s784_s8, 16  ;;  %p1013_p1 = scmp.lt.s32.totalorder %s784_s8, %s784_s8 }
  0x2f   :  { %334 = vmatpush2.bf16.msra.mxu0 %v969_v34  ;;  %v999_v57 = vld [vmem:[%s1330_s2 + $0x18] sm:$0xff]   ;;  %862 = vmatprep.subr.bf16.mxu1 %v998_v56  ;;  %v1001_v59 = vld [vmem:[%s1330_s2 + $0x10] sm:$0xff]   ;;  %v1004_v62 = vld [vmem:[%s1330_s2 + $0x40] sm:$0xff]   ;;  %vm775_vm2 = vcmask 516096   ;;  %p1009_p0 = scmp.ne.s32.totalorder %s784_s8, %s1008_s9  ;;  %s1012_s0 = scalar_lea.vmem %s784_s8, 32 }
  0x30   :  { %335 = vmatprep.subr.bf16.mxu0 %v970_v35  ;;  %863 = vmatpush3.bf16.msra.mxu1 %v999_v57  ;;  %v1005_v63 = vld [vmem:[%s1330_s2] sm:$0xff]   ;;  %v1006_v0 = vld [vmem:[%s1330_s2 + $0x88] sm:$0xff]   ;;  %p1014_p2 = scmp.lt.s32.totalorder %s1012_s0, %s1008_s9 }
  0x31   :  { %864 = vmatprep.subr.bf16.mxu1 %v1000_v58  ;;  %v64_v5 = vld [vmem:[%s1331_s3] ss:$8 sm:$0x3] }
  0x32   :  { %v1265_v6 = vrot.slane %v64_v5, %v107_v3  ;;  %v1267_v7 = vrot.slane %v64_v5, %v103_v4  ;;  %v411_v4 = vunpack.c.h.bf16 %v1213_v48  ;;  %p1015_p3 = por %p1014_p2, %p1013_p1 }
  0x33   :  { %336 = vmatpush2.bf16.msra.mxu0 %v972_v36 }
  0x34   :  { %337 = vmatprep.subr.bf16.mxu0 %v973_v37  ;;  %865 = vmatpush3.bf16.msra.mxu1 %v1001_v59  ;;  %v406_v37 = vunpack.c.l.bf16 %v1199_v44  ;;  %p1016_p4 = pnand %p1015_p3, %p1009_p0 }
  0x35   :  { %866 = vmatprep.subr.bf16.mxu1 %v1002_v60 }
  0x37   :  { %338 = vmatpush2.bf16.msra.mxu0 %v975_v38 }
  0x38   :  { %339 = vmatprep.subr.bf16.mxu0 %v976_v39  ;;  %867 = vmatpush3.bf16.msra.mxu1 %v1003_v61 }
  0x39   :  { %868 = vmatprep.subr.bf16.mxu1 %v1004_v62  ;;  %v409_v62 = vunpack.c.h.bf16 %v1208_v47 }
  0x3b   :  { %340 = vmatpush2.bf16.msra.mxu0 %v978_v40 }
  0x3c   :  { %341 = vmatprep.subr.bf16.mxu0 %v979_v41  ;;  %869 = vmatpush3.bf16.msra.mxu1 %v1005_v63 }
  0x3d   :  { %905 = vmatprep.subr.bf16.mxu1 %v1006_v0 }
  0x3f   :  { %342 = vmatpush2.bf16.msra.mxu0 %v981_v42  ;;  %v407_v42 = vunpack.c.h.bf16 %v1199_v44 }
  0x42   :  { %344 = vmatmul.mubr.bf16.vlgmr.msra.gmra.mxu0 %v791_v45 }
  0x43   :  { %353 = vmatprep.mubr.bf16.mxu0 %v794_v46  ;;  %v404_v46 = vunpack.c.l.bf16 %v1194_v43  ;;  %v410_v43 = vunpack.c.l.bf16 %v1213_v48 }
  0x4a   :  { %354 = vmatmul.mubr.bf16.gmra.mxu0 %v793_v49 }
  0x4b   :  { %363 = vmatprep.mubr.bf16.mxu0 %v796_v50 }
  0x52   :  { %364 = vmatmul.mubr.bf16.gmra.mxu0 %v795_v53 }
  0x53   :  { %373 = vmatprep.mubr.bf16.mxu0 %v798_v54 }
  0x5a   :  { %374 = vmatmul.mubr.bf16.gmra.mxu0 %v797_v55 }
 0x102   :  { %v345_v8 = vpop.f32.mrf.mxu0 }
 0x103   :  { %v346_v11 = vadd.f32 %v345_v8, %v1267_v7  ;;  %v408_v8 = vunpack.c.l.bf16 %v1208_v47  ;;  %v414_v47 = vunpack.c.l.bf16 %v1227_v52 }
 0x104   :  { %v347_v9 = vpop.f32.mrf.mxu0 }
 0x105   :  { %v348_v10 = vadd.f32 %v347_v9, %v1265_v6  ;;  %v384_v23 = vmax.f32 %v346_v11, 0.0 }
 0x106   :  { %v349_v12 = vpop.f32.mrf.mxu0 }
 0x107   :  { %v350_v15 = vadd.f32 %v349_v12, %v1267_v7  ;;  %v385_v19 = vmax.f32 %v348_v10, 0.0  ;;  %v416_v32 = vadd.f32 %v400_v24, %v384_v23 }
 0x108   :  { %v351_v17 = vpop.f32.mrf.mxu0 }
 0x109   :  { %v386_v20 = vmax.f32 %v350_v15, 0.0  ;;  %v352_v21 = vadd.f32 %v351_v17, %v1265_v6  ;;  %v417_v30 = vadd.f32 %v401_v18, %v385_v19 }
 0x10a   :  { %v355_v25 = vpop.f32.mrf.mxu0 }
 0x10b   :  { %v387_v26 = vmax.f32 %v352_v21, 0.0  ;;  %v418_v27 = vadd.f32 %v402_v16, %v386_v20  ;;  %v356_v33 = vadd.f32 %v355_v25, %v1267_v7 }
 0x10c   :  { %v357_v28 = vpop.f32.mrf.mxu0 }
 0x10d   :  { %v358_v29 = vadd.f32 %v357_v28, %v1265_v6  ;;  %v419_v31 = vadd.f32 %v403_v22, %v387_v26  ;;  %v432_v38 = vpack.c.bf16 %v418_v27, %v416_v32  ;;  %v388_v45 = vmax.f32 %v356_v33, 0.0 }
 0x10e   :  { %v359_v34 = vpop.f32.mrf.mxu0  ;;  %v413_v22 = vunpack.c.h.bf16 %v1222_v51  ;;  %v415_v28 = vunpack.c.h.bf16 %v1227_v52 }
 0x10f   :  { %v360_v35 = vadd.f32 %v359_v34, %v1267_v7  ;;  %v433_v36 = vpack.c.bf16 %v419_v31, %v417_v30  ;;  %v389_v39 = vmax.f32 %v358_v29, 0.0  ;;  %v420_v58 = vadd.f32 %v404_v46, %v388_v45 }
 0x110   :  { %v361_v13 = vpop.f32.mrf.mxu0  ;;  %v412_v30 = vunpack.c.l.bf16 %v1222_v51  ;;  %v65_v51 = vld [vmem:[%s1331_s3 + $0x1] ss:$0 sm:$0xff] }
 0x111   :  { %v390_v40 = vmax.f32 %v360_v35, 0.0  ;;  %v362_v41 = vadd.f32 %v361_v13, %v1265_v6  ;;  %568 = vmatprep.mubr.bf16.mxu1 %v433_v36  ;;  %v421_v55 = vadd.f32 %v405_v14, %v389_v39 }
 0x112   :  { %v365_v49 = vpop.f32.mrf.mxu0  ;;  %569 = vmatmul.mubr.bf16.vlgmr.msra.gmra.mxu1 %v432_v38 }
 0x113   :  { %v391_v50 = vmax.f32 %v362_v41, 0.0  ;;  %906 = vmatpush3.bf16.msra.mxu1 %v1006_v0  ;;  %v422_v53 = vadd.f32 %v406_v37, %v390_v40  ;;  %v366_v59 = vadd.f32 %v365_v49, %v1267_v7 }
 0x114   :  { %v367_v54 = vpop.f32.mrf.mxu0 }
 0x115   :  { %v423_v56 = vadd.f32 %v407_v42, %v391_v50  ;;  %v368_v57 = vadd.f32 %v367_v54, %v1265_v6  ;;  %v434_v1 = vpack.c.bf16 %v422_v53, %v420_v58  ;;  %v392_v5 = vmax.f32 %v366_v59, 0.0 }
 0x116   :  { %v369_v60 = vpop.f32.mrf.mxu0 }
 0x117   :  { %v370_v44 = vadd.f32 %v369_v60, %v1267_v7  ;;  %v435_v61 = vpack.c.bf16 %v423_v56, %v421_v55  ;;  %v393_v0 = vmax.f32 %v368_v57, 0.0  ;;  %v424_v18 = vadd.f32 %v408_v8, %v392_v5 }
 0x118   :  { %v371_v63 = vpop.f32.mrf.mxu0 }
 0x119   :  { %v394_v2 = vmax.f32 %v370_v44, 0.0  ;;  %v372_v3 = vadd.f32 %v371_v63, %v1265_v6  ;;  %576 = vmatprep.mubr.bf16.mxu1 %v435_v61  ;;  %v425_v15 = vadd.f32 %v409_v62, %v393_v0 }
 0x11a   :  { %v375_v9 = vpop.f32.mrf.mxu0  ;;  %577 = vmatmul.mubr.bf16.gmra.mxu1 %v434_v1 }
 0x11b   :  { %v395_v10 = vmax.f32 %v372_v3, 0.0  ;;  %v426_v11 = vadd.f32 %v410_v43, %v394_v2  ;;  %v376_v19 = vadd.f32 %v375_v9, %v1267_v7 }
 0x11c   :  { %v377_v12 = vpop.f32.mrf.mxu0 }
 0x11d   :  { %v427_v16 = vadd.f32 %v411_v4, %v395_v10  ;;  %v378_v17 = vadd.f32 %v377_v12, %v1265_v6  ;;  %v436_v24 = vpack.c.bf16 %v426_v11, %v424_v18  ;;  %v396_v29 = vmax.f32 %v376_v19, 0.0 }
 0x11e   :  { %v379_v20 = vpop.f32.mrf.mxu0 }
 0x11f   :  { %v380_v21 = vadd.f32 %v379_v20, %v1267_v7  ;;  %v437_v48 = vpack.c.bf16 %v427_v16, %v425_v15  ;;  %v397_v25 = vmax.f32 %v378_v17, 0.0  ;;  %v428_v34 = vadd.f32 %v412_v30, %v396_v29 }
 0x120   :  { %v381_v23 = vpop.f32.mrf.mxu0 }
 0x121   :  { %v398_v26 = vmax.f32 %v380_v21, 0.0  ;;  %v382_v27 = vadd.f32 %v381_v23, %v1265_v6  ;;  %584 = vmatprep.mubr.bf16.mxu1 %v437_v48  ;;  %v429_v32 = vadd.f32 %v413_v22, %v397_v25  ;;  %v1007_v6 = vld [vmem:[%s1330_s2 + $0x80] sm:$0xff]   ;;  %v1030_v48 = vmov 0.0  }
 0x122   :  { %585 = vmatmul.mubr.bf16.gmra.mxu1 %v436_v24  ;;  %907 = vmatprep.subr.bf16.mxu1 %v1007_v6  ;;  %v67_v22 = vld [vmem:[%s1331_s3 + $0x3] ss:$0 sm:$0xff] }
 0x123   :  { %v399_v31 = vmax.f32 %v382_v27, 0.0  ;;  %v430_v7 = vadd.f32 %v414_v47, %v398_v26  ;;  %908 = vmatpush3.bf16.msra.mxu1 %v1007_v6  ;;  %917 = vmatprep.subr.bf16.mxu0 %v1030_v48  ;;  %v1032_v47 = vmov 0  }
 0x124   :  { %925 = vmatprep.mubr.msk.bf16.mxu0 %vm1031_vm1, %v1030_v48  ;;  %933 = vset.pattern.permute.xlu0 %v1032_v47 }
 0x125   :  { %v431_v33 = vadd.f32 %v415_v28, %v399_v31  ;;  %v438_v36 = vpack.c.bf16 %v430_v7, %v428_v34  ;;  %717 = vperm.xlu0 %933, %v67_v22   ;;  %v66_v28 = vld [vmem:[%s1331_s3 + $0x2] ss:$0 sm:$0xff] }
 0x127   :  { %v439_v35 = vpack.c.bf16 %v431_v33, %v429_v32 }
 0x129   :  { %592 = vmatprep.mubr.bf16.mxu1 %v439_v35 }
 0x12a   :  { %593 = vmatmul.mubr.bf16.gmra.mxu1 %v438_v36 }
 0x1d2   :  { %v870_v52 = vpop.f32.mrf.mxu1 }
 0x1d4   :  { %v871_v14 = vpop.f32.mrf.mxu1 }
 0x1d5   :  { %v872_v37 = vadd.f32 %v871_v14, %v870_v52 }
 0x1d6   :  { %v873_v13 = vpop.f32.mrf.mxu1 }
 0x1d7   :  { %v571_v39 = vadd.f32 %v872_v37, %v65_v51 }
 0x1d8   :  { %v874_v38 = vpop.f32.mrf.mxu1 }
 0x1d9   :  { %v875_v40 = vadd.f32 %v874_v38, %v873_v13  ;;  %v601_v46 = vmax.f32 %v571_v39, 0.0 }
 0x1da   :  { %v876_v41 = vpop.f32.mrf.mxu1 }
 0x1db   :  { %v574_v42 = vadd.f32 %v875_v40, %v65_v51 }
 0x1dc   :  { %v877_v45 = vpop.f32.mrf.mxu1 }
 0x1dd   :  { %v602_v49 = vmax.f32 %v574_v42, 0.0  ;;  %v878_v50 = vadd.f32 %v877_v45, %v876_v41 }
 0x1de   :  { %v879_v53 = vpop.f32.mrf.mxu1 }
 0x1df   :  { %v609_v54 = vpack.c.bf16 %v602_v49, %v601_v46  ;;  %v579_v56 = vadd.f32 %v878_v50, %v65_v51 }
 0x1e0   :  { %v880_v55 = vpop.f32.mrf.mxu1 }
 0x1e1   :  { %v881_v57 = vadd.f32 %v880_v55, %v879_v53  ;;  %909 = vmatprep.mubr.msk.bf16.mxu1 %vm625_vm0, %v609_v54  ;;  %v603_v44 = vmax.f32 %v579_v56, 0.0  ;;  %v63_v56 = vld [vmem:[%s1330_s2 + $0x90] sm:$0x1] }
 0x1e2   :  { %v882_v58 = vpop.f32.mrf.mxu1 }
 0x1e3   :  { %v582_v59 = vadd.f32 %v881_v57, %v65_v51  ;;  %v718_v57 = vpop.permute.xlu0 %717 }
 0x1e4   :  { %v883_v60 = vpop.f32.mrf.mxu1 }
 0x1e5   :  { %v604_v61 = vmax.f32 %v582_v59, 0.0  ;;  %v884_v62 = vadd.f32 %v883_v60, %v882_v58 }
 0x1e6   :  { %v885_v43 = vpop.f32.mrf.mxu1 }
 0x1e7   :  { %v610_v63 = vpack.c.bf16 %v604_v61, %v603_v44  ;;  %v587_v0 = vadd.f32 %v884_v62, %v65_v51 }
 0x1e8   :  { %v886_v1 = vpop.f32.mrf.mxu1 }
 0x1e9   :  { %v887_v2 = vadd.f32 %v886_v1, %v885_v43  ;;  %910 = vmatmul.mubr.msk.bf16.vlgmr.msra.gmra.mxu1 %vm625_vm0, %v610_v63  ;;  %v605_v8 = vmax.f32 %v587_v0, 0.0 }
 0x1ea   :  { %v888_v3 = vpop.f32.mrf.mxu1 }
 0x1eb   :  { %v590_v4 = vadd.f32 %v887_v2, %v65_v51 }
 0x1ec   :  { %v889_v5 = vpop.f32.mrf.mxu1 }
 0x1ed   :  { %v606_v9 = vmax.f32 %v590_v4, 0.0  ;;  %v890_v10 = vadd.f32 %v889_v5, %v888_v3 }
 0x1ee   :  { %v891_v11 = vpop.f32.mrf.mxu1 }
 0x1ef   :  { %v611_v12 = vpack.c.bf16 %v606_v9, %v605_v8  ;;  %v595_v16 = vadd.f32 %v890_v10, %v65_v51 }
 0x1f0   :  { %v892_v15 = vpop.f32.mrf.mxu1 }
 0x1f1   :  { %v893_v17 = vadd.f32 %v892_v15, %v891_v11  ;;  %913 = vmatprep.mubr.msk.bf16.mxu1 %vm625_vm0, %v611_v12  ;;  %v607_v19 = vmax.f32 %v595_v16, 0.0 }
 0x1f3   :  { %v598_v18 = vadd.f32 %v893_v17, %v65_v51 }
 0x1f5   :  { %v608_v20 = vmax.f32 %v598_v18, 0.0 }
 0x1f7   :  { %v612_v21 = vpack.c.bf16 %v608_v20, %v607_v19 }
 0x1f9   :  { %914 = vmatmul.mubr.msk.bf16.gmra.mxu1 %vm625_vm0, %v612_v21 }
 0x2a9   :  { %v911_v23 = vpop.f32.mrf.mxu1 }
 0x2aa   :  { %v681_v38 = vadd.f32 %v911_v23, %v66_v28 }
 0x2ab   :  { %v672_v24 = vpop.f32.mrf.mxu1 }
 0x2ac   :  { %v705_v41 = vmax.f32 %v681_v38, 0.0  ;;  %v673_v46 = vadd.f32 %v672_v24, %v66_v28 }
 0x2ad   :  { %v912_v25 = vpop.f32.mrf.mxu1 }
 0x2ae   :  { %v684_v51 = vadd.f32 %v912_v25, %v66_v28  ;;  %v703_v53 = vmax.f32 %v673_v46, 0.0 }
 0x2af   :  { %v675_v26 = vpop.f32.mrf.mxu1 }
 0x2b0   :  { %v706_v39 = vmax.f32 %v684_v51, 0.0  ;;  %v676_v45 = vadd.f32 %v675_v26, %v66_v28 }
 0x2b2   :  { %v712_v42 = vpack.c.bf16 %v706_v39, %v705_v41  ;;  %v704_v49 = vmax.f32 %v676_v45, 0.0 }
 0x2b4   :  { %v727_v50 = vsel %vm625_vm0, %v712_v42, 0  ;;  %v711_v54 = vpack.c.bf16 %v704_v49, %v703_v53 }
 0x2b6   :  { %v724_v55 = vsel %vm625_vm0, %v711_v54, 0 }
 0x2b9   :  { %v915_v27 = vpop.f32.mrf.mxu1 }
 0x2ba   :  { %v697_v30 = vadd.f32 %v915_v27, %v66_v28 }
 0x2bb   :  { %v688_v29 = vpop.f32.mrf.mxu1 }
 0x2bc   :  { %v709_v33 = vmax.f32 %v697_v30, 0.0  ;;  %v689_v36 = vadd.f32 %v688_v29, %v66_v28 }
 0x2bd   :  { %v916_v31 = vpop.f32.mrf.mxu1 }
 0x2be   :  { %v700_v7 = vadd.f32 %v916_v31, %v66_v28  ;;  %v707_v37 = vmax.f32 %v689_v36, 0.0 }
 0x2bf   :  { %v691_v32 = vpop.f32.mrf.mxu1 }
 0x2c0   :  { %v710_v34 = vmax.f32 %v700_v7, 0.0  ;;  %v692_v35 = vadd.f32 %v691_v32, %v66_v28 }
 0x2c2   :  { %v714_v6 = vpack.c.bf16 %v710_v34, %v709_v33  ;;  %v708_v52 = vmax.f32 %v692_v35, 0.0 }
 0x2c4   :  { %v733_v14 = vsel %vm625_vm0, %v714_v6, 0  ;;  %v713_v13 = vpack.c.bf16 %v708_v52, %v707_v37 }
 0x2c5   :  { %918 = vmatpush3.bf16.xpose.msra.mxu0 %v733_v14 }
 0x2c6   :  { %919 = vmatprep.subr.bf16.mxu0 %v1030_v48  ;;  %v730_v40 = vsel %vm625_vm0, %v713_v13, 0 }
 0x2cd   :  { %920 = vmatpush3.bf16.xpose.msra.mxu0 %v730_v40 }
 0x2ce   :  { %921 = vmatprep.subr.bf16.mxu0 %v1030_v48 }
 0x2d5   :  { %922 = vmatpush3.bf16.xpose.msra.mxu0 %v727_v50 }
 0x2d6   :  { %923 = vmatprep.subr.bf16.mxu0 %v1030_v48 }
 0x2dd   :  { %924 = vmatpush3.bf16.xpose.msra.mxu0 %v724_v55 }
 0x2e4   :  { %926 = vmatmul.mubr.msk.bf16.vlgmr.msra.gmra.mxu0 %vm625_vm0, %v63_v56 }
 0x3a4   :  { %v769_v58 = vpop.f32.mrf.mxu0 }
 0x3a5   :  { %v770_v59 = vadd.f32 %v769_v58, %v718_v57 }
 0x3a6   :  { %v927_v60 = vpop.f32.mrf.mxu0 }
 0x3a7   :  { %776 = vst.msk [vmem:[#allocation2] sm:$0x1] %vm775_vm2, %v770_v59 }
 0x3a8   :  { %v772_v44 = vpop.f32.mrf.mxu0 }
 0x3a9   :  { %1019 = shalt.err (!%p1016_p4)
}
 0x3aa   :  { %786 = dma.vmem_to_hbm [thread:$0]  %s784_s8, 16, %s1332_s4, [#allocation3]   ;;  %v928_v61 = vpop.f32.mrf.mxu0 }
 0x3ab   :  { %1028 = dma.done.wait [#allocation3], 16  }
 0x3ac   :  { %1029 = vsyncadd [#allocation3], 4294967280 }
 0x3ad   :  { %790 = vsyncpa [#allocation3], 1 }

</bundles_post_ra>
